<compile_context>
chip_gen: v5e
topology: v5e:2x2
jax: 0.10.0
libtpu: 0.0.40
codegen_flags: <defaults>
</compile_context>

<pallas_src>
import functools
import math

import jax
import jax.numpy as jnp
from jax.experimental import pallas as pl
from jax.experimental.pallas import tpu as pltpu

LANE = 128


def _round_up(x, m):
    return ((x + m - 1) // m) * m


def _pad2d(a, rows, cols):
    r, c = a.shape
    if r == rows and c == cols:
        return a
    return jnp.pad(a, ((0, rows - r), (0, cols - c)))


@functools.lru_cache(maxsize=None)
def _vmem_budget():
    """Generation-dependent scoped-VMEM limit (bytes)."""
    kind = ""
    try:
        kind = jax.devices()[0].device_kind.lower()
    except Exception:
        pass
    if "7" in kind:                        # v7x: 64 MiB per TensorCore
        return 44 * 1024 * 1024
    if "v5" in kind or "v6" in kind:       # v5e / v6e: 128 MiB physical VMEM
        return 100 * 1024 * 1024
    try:                                   # unknown generation: ask runtime, keep headroom
        cap = int(pltpu.get_tpu_info().vmem_capacity_bytes)
        return max(32 * 1024 * 1024, min(cap - 16 * 1024 * 1024, (cap * 3) // 4))
    except Exception:
        return 48 * 1024 * 1024


# --------------------------------------------------------------------------
# Stage 1: support = x @ W   (computed once for layer 1, tiled over node rows)
# --------------------------------------------------------------------------
def _support_kernel(x_ref, w_ref, o_ref):
    o_ref[...] = jnp.dot(x_ref[...], w_ref[...],
                         preferred_element_type=jnp.float32).astype(o_ref.dtype)


def _support_matmul(x, w, *, tile_n, out_dtype):
    N, F = x.shape
    H = w.shape[1]
    assert N % tile_n == 0 and H % LANE == 0
    return pl.pallas_call(
        _support_kernel,
        out_shape=jax.ShapeDtypeStruct((N, H), out_dtype),
        grid_spec=pltpu.PrefetchScalarGridSpec(
            num_scalar_prefetch=0,
            grid=(N // tile_n,),
            in_specs=[
                pl.BlockSpec((tile_n, F), lambda i: (i, 0)),   # x row tile
                pl.BlockSpec((F, H), lambda i: (0, 0)),        # W (full, small)
            ],
            out_specs=pl.BlockSpec((tile_n, H), lambda i: (i, 0)),
        ),
        compiler_params=pltpu.CompilerParams(
            dimension_semantics=("parallel",),
            vmem_limit_bytes=_vmem_budget()),
    )(x, w)


# --------------------------------------------------------------------------
# Stage 2: aggregation  acc = adj @ support  (k-tiled, f32 VMEM accumulator)
#   finalize:  out = acc + b  [ReLU]  [@ W_next  (fused next-layer support)]
# --------------------------------------------------------------------------
def _aggregate_kernel(adj_ref, s_ref, b_ref, *rest,
                      tile_k, support_resident, apply_relu, fuse_next):
    if fuse_next:
        w_next_ref, o_ref, acc_ref = rest
    else:
        o_ref, acc_ref = rest

    k = pl.program_id(1)

    @pl.when(k == 0)
    def _():
        acc_ref[...] = jnp.zeros_like(acc_ref)

    if support_resident:
        # support is the full array, VMEM-resident across the whole k sweep
        # (constant block index -> single DMA); slice the k-th row block here.
        start = pl.multiple_of(k * tile_k, tile_k)
        s_blk = s_ref[pl.ds(start, tile_k), :]
    else:
        s_blk = s_ref[...]

    acc_ref[...] += jnp.dot(adj_ref[...], s_blk,
                            preferred_element_type=jnp.float32)

    @pl.when(k == pl.num_programs(1) - 1)
    def _():
        h = acc_ref[...] + b_ref[...]
        if apply_relu:
            h = jnp.maximum(h, 0.0)
        if fuse_next:
            # Fused next-layer support: s2 = h @ W2 (tiny epilogue matmul, hides
            # under the pipeline; h never round-trips HBM).
            h = jnp.dot(h.astype(w_next_ref.dtype), w_next_ref[...],
                        preferred_element_type=jnp.float32)
        o_ref[...] = h.astype(o_ref.dtype)


def _aggregate(adj, support, bias, w_next=None, *, apply_relu, tile_n, tile_k,
               out_dtype):
    Np = adj.shape[0]
    H = support.shape[1]
    H_out = w_next.shape[1] if w_next is not None else H
    assert Np % tile_n == 0 and Np % tile_k == 0
    assert H % LANE == 0 and H_out % LANE == 0

    budget = _vmem_budget()
    itemsize = jnp.dtype(support.dtype).itemsize
    # Keep support fully VMEM-resident across the k sweep when it fits (count 2x
    # for pipeline buffers); otherwise fall back to the per-step tiled spec.
    support_resident = (2 * Np * H * itemsize) <= budget // 3

    in_specs = [pl.BlockSpec((tile_n, tile_k), lambda i, k: (i, k))]  # adj tile
    if support_resident:
        in_specs.append(pl.BlockSpec((Np, H), lambda i, k: (0, 0)))   # resident support
    else:
        in_specs.append(pl.BlockSpec((tile_k, H), lambda i, k: (k, 0)))
    in_specs.append(pl.BlockSpec((1, H), lambda i, k: (0, 0)))        # bias
    operands = [adj, support, bias]
    if w_next is not None:
        in_specs.append(pl.BlockSpec((H, H_out), lambda i, k: (0, 0)))  # W2 (full, small)
        operands.append(w_next)

    kernel = functools.partial(
        _aggregate_kernel, tile_k=tile_k, support_resident=support_resident,
        apply_relu=apply_relu, fuse_next=w_next is not None)

    return pl.pallas_call(
        kernel,
        out_shape=jax.ShapeDtypeStruct((Np, H_out), out_dtype),
        grid_spec=pltpu.PrefetchScalarGridSpec(
            num_scalar_prefetch=0,
            grid=(Np // tile_n, Np // tile_k),          # reduction axis last
            in_specs=in_specs,
            out_specs=pl.BlockSpec((tile_n, H_out), lambda i, k: (i, 0)),
            scratch_shapes=[pltpu.VMEM((tile_n, H), jnp.float32)],
        ),
        compiler_params=pltpu.CompilerParams(
            dimension_semantics=("parallel", "arbitrary"),
            vmem_limit_bytes=budget),
    )(*operands)


# --------------------------------------------------------------------------
# Tiny-problem path: both GCN layers fused in one grid-less pallas_call.
# --------------------------------------------------------------------------
def _gcn_fused_kernel(x_ref, adj_ref, w1_ref, b1_ref, w2_ref, b2_ref, o_ref):
    s1 = jnp.dot(x_ref[...], w1_ref[...], preferred_element_type=jnp.float32)
    h = jnp.dot(adj_ref[...], s1, preferred_element_type=jnp.float32) + b1_ref[...]
    h = jnp.maximum(h, 0.0)
    # dropout: identity in eval mode
    s2 = jnp.dot(h, w2_ref[...], preferred_element_type=jnp.float32)
    out = jnp.dot(adj_ref[...], s2, preferred_element_type=jnp.float32) + b2_ref[...]
    o_ref[...] = out.astype(o_ref.dtype)


def _gcn_fused_small(x, adj, w1, b1, w2, b2):
    N = x.shape[0]
    H2 = w2.shape[1]
    return pl.pallas_call(
        _gcn_fused_kernel,
        out_shape=jax.ShapeDtypeStruct((N, H2), jnp.float32),
        compiler_params=pltpu.CompilerParams(vmem_limit_bytes=_vmem_budget()),
    )(x, adj, w1, b1, w2, b2)


# --------------------------------------------------------------------------
# Parameters + forward
# --------------------------------------------------------------------------
def init_gcn_params(key, nfeat, nhid, out_dim):
    """Matches GraphConvolution.reset_parameters: U(-stdv, stdv), stdv=1/sqrt(out_features)."""
    k1, k2, k3, k4 = jax.random.split(key, 4)
    stdv1 = 1.0 / math.sqrt(nhid)
    stdv2 = 1.0 / math.sqrt(out_dim)
    w1 = jax.random.uniform(k1, (nfeat, nhid), jnp.float32, -stdv1, stdv1)
    b1 = jax.random.uniform(k2, (1, nhid), jnp.float32, -stdv1, stdv1)
    w2 = jax.random.uniform(k3, (nhid, out_dim), jnp.float32, -stdv2, stdv2)
    b2 = jax.random.uniform(k4, (1, out_dim), jnp.float32, -stdv2, stdv2)
    return (w1, b1, w2, b2)


def gcn_forward(x, adj, params, *, tile_n=256, tile_k=512, use_fused=None,
                compute_dtype=jnp.float32):
    """GCN.forward (beltrami=False, eval mode):
        x = relu(gc1(x, adj)); x = dropout(x) [identity in eval]; x = gc2(x, adj).

    compute_dtype=jnp.bfloat16 casts adj/x/W/support operands to bf16 (native MXU
    rate, half the adj HBM traffic); accumulation and the final output stay f32.
    """
    w1, b1, w2, b2 = params
    N, F = x.shape
    H1 = w1.shape[1]
    H2 = w2.shape[1]
    b1 = b1.reshape(1, -1).astype(jnp.float32)
    b2 = b2.reshape(1, -1).astype(jnp.float32)

    # Lane-dense padding of the feature dims (zero columns/rows are exact no-ops here).
    H1p = _round_up(H1, LANE)
    H2p = _round_up(H2, LANE)

    budget = _vmem_budget()

    if use_fused is None:
        Np_small = _round_up(max(N, 8), 8)
        fused_bytes = 4 * (Np_small * F + Np_small * Np_small + F * H1p
                           + H1p * H2p + 3 * Np_small * H1p + 2 * Np_small * H2p
                           + H1p + H2p)
        use_fused = fused_bytes <= budget // 4   # generation-dependent threshold

    if use_fused:
        Np = _round_up(max(N, 8), 8)
        xp = _pad2d(x, Np, F)
        adjp = _pad2d(adj, Np, Np)
        w1p = _pad2d(w1, F, H1p)
        b1p = _pad2d(b1, 1, H1p)
        w2p = _pad2d(w2, H1p, H2p)
        b2p = _pad2d(b2, 1, H2p)
        out = _gcn_fused_small(xp, adjp, w1p, b1p, w2p, b2p)
        return out[:N, :H2]

    # ---------------- tiled path ----------------
    # Clamp tiles for small graphs, then pad N so BOTH tiles divide it (lcm, not max).
    tile_n = min(tile_n, _round_up(N, LANE))
    tile_k = min(tile_k, _round_up(N, LANE))
    Np = _round_up(N, math.lcm(tile_n, tile_k))

    cdt = jnp.dtype(compute_dtype)
    xp = _pad2d(x, Np, F).astype(cdt)
    adjp = _pad2d(adj, Np, Np).astype(cdt)
    w1p = _pad2d(w1, F, H1p).astype(cdt)
    b1p = _pad2d(b1, 1, H1p)
    w2p = _pad2d(w2, H1p, H2p).astype(cdt)
    b2p = _pad2d(b2, 1, H2p)

    # Layer 1 support (once), then layer-1 aggregation with the layer-2 support
    # matmul fused into its finalize:  s2 = relu(adj @ s1 + b1) @ W2.
    # NOTE: padded rows (>= N) of s2 equal relu(b1) @ W2 (non-zero), but the padded
    # adj COLUMNS in the second aggregation are zero, so the real outputs are exact.
    s1 = _support_matmul(xp, w1p, tile_n=tile_n, out_dtype=cdt)            # (Np, H1p)
    s2 = _aggregate(adjp, s1, b1p, w2p, apply_relu=True,
                    tile_n=tile_n, tile_k=tile_k, out_dtype=cdt)           # (Np, H2p)
    # dropout: identity in eval mode
    out = _aggregate(adjp, s2, b2p, apply_relu=False,
                     tile_n=tile_n, tile_k=tile_k, out_dtype=jnp.float32)  # adj @ s2 + b2
    return out[:N, :H2]


def _make_adj(key, n):
    """Deterministic symmetric normalized adjacency (with self-loops)."""
    a = (jax.random.uniform(key, (n, n)) > 0.8).astype(jnp.float32)
    a = jnp.maximum(a, a.T) + jnp.eye(n, dtype=jnp.float32)
    deg = jnp.sum(a, axis=1)
    d_inv_sqrt = 1.0 / jnp.sqrt(deg)
    return a * d_inv_sqrt[:, None] * d_inv_sqrt[None, :]


def _reference(x, adj, params):
    w1, b1, w2, b2 = params
    h = jnp.maximum(adj @ (x @ w1) + b1.reshape(1, -1), 0.0)
    return adj @ (h @ w2) + b2.reshape(1, -1)


if __name__ == "__main__":
    key = jax.random.PRNGKey(0)

    # --- Test 1: toy sizes (auto-selects the fused, grid-less kernel) ------------
    k_x, k_adj, k_params, key = jax.random.split(key, 4)
    N, nfeat, nhid, out_dim = 32, 16, 32, 8
    x = jax.random.normal(k_x, (N, nfeat), dtype=jnp.float32)
    adj = _make_adj(k_adj, N)
    params = init_gcn_params(k_params, nfeat, nhid, out_dim)

    out = gcn_forward(x, adj, params)
    jax.block_until_ready(out)
    ref = _reference(x, adj, params)
    assert out.shape == (N, out_dim)
    assert jnp.allclose(out, ref, atol=1e-5, rtol=1e-5)

    # --- Test 2: forced tiled path, small tiles (multi-step grid + accumulator) --
    k_x2, k_adj2, k_params2, key = jax.random.split(key, 4)
    N2, nfeat2, nhid2, out_dim2 = 256, 64, 64, 16
    x2 = jax.random.normal(k_x2, (N2, nfeat2), dtype=jnp.float32)
    adj2 = _make_adj(k_adj2, N2)
    params2 = init_gcn_params(k_params2, nfeat2, nhid2, out_dim2)

    out2 = gcn_forward(x2, adj2, params2, tile_n=128, tile_k=128, use_fused=False)
    jax.block_until_ready(out2)
    ref2 = _reference(x2, adj2, params2)
    assert out2.shape == (N2, out_dim2)
    assert jnp.allclose(out2, ref2, atol=1e-4, rtol=1e-4)

    # --- Test 3: default big tiles (256x512), bf16 operands, resident support -----
    k_x3, k_adj3, k_params3, key = jax.random.split(key, 4)
    N3, nfeat3, nhid3, out_dim3 = 1024, 64, 64, 16
    x3 = jax.random.normal(k_x3, (N3, nfeat3), dtype=jnp.float32)
    adj3 = _make_adj(k_adj3, N3)
    params3 = init_gcn_params(k_params3, nfeat3, nhid3, out_dim3)

    out3 = gcn_forward(x3, adj3, params3, use_fused=False,
                       compute_dtype=jnp.bfloat16)
    jax.block_until_ready(out3)
    ref3 = _reference(x3, adj3, params3)
    assert out3.shape == (N3, out_dim3)
    assert jnp.allclose(out3, ref3, atol=1e-1, rtol=1e-1)   # bf16 operands, f32 accum

    print("KERNEL_OK")
</pallas_src>

<mosaic_0001>
module attributes {stable_mosaic.version = 11 : i64} {
  func.func @_gcn_fused_kernel(%arg0: memref<32x16xf32, #tpu.memory_space<vmem>>, %arg1: memref<32x32xf32, #tpu.memory_space<vmem>>, %arg2: memref<16x128xf32, #tpu.memory_space<vmem>>, %arg3: memref<1x128xf32, #tpu.memory_space<vmem>>, %arg4: memref<128x128xf32, #tpu.memory_space<vmem>>, %arg5: memref<1x128xf32, #tpu.memory_space<vmem>>, %arg6: memref<32x128xf32, #tpu.memory_space<vmem>>) attributes {dimension_semantics = [], scalar_prefetch = 0 : i64, scratch_operands = 0 : i64, tpu.core_type = #tpu.core_type<tc>} {
    %c0 = arith.constant 0 : index
    %c0_0 = arith.constant 0 : index
    %0 = vector.load %arg0[%c0, %c0_0] : memref<32x16xf32, #tpu.memory_space<vmem>>, vector<32x16xf32>
    %c0_1 = arith.constant 0 : index
    %c0_2 = arith.constant 0 : index
    %1 = vector.load %arg2[%c0_1, %c0_2] : memref<16x128xf32, #tpu.memory_space<vmem>>, vector<16x128xf32>
    %cst = arith.constant dense<0.000000e+00> : vector<32x128xf32>
    %2 = tpu.matmul %0, %1, %cst {dimension_numbers = #tpu.dot_dimension_numbers<[1], [0], [0], [1], [0, 0, 1, 1], [], []>} : vector<32x16xf32>, vector<16x128xf32>, vector<32x128xf32> -> vector<32x128xf32>
    %c0_3 = arith.constant 0 : index
    %c0_4 = arith.constant 0 : index
    %3 = vector.load %arg1[%c0_3, %c0_4] : memref<32x32xf32, #tpu.memory_space<vmem>>, vector<32x32xf32>
    %cst_5 = arith.constant dense<0.000000e+00> : vector<32x128xf32>
    %4 = tpu.matmul %3, %2, %cst_5 {dimension_numbers = #tpu.dot_dimension_numbers<[1], [0], [0], [1], [0, 0, 1, 1], [], []>} : vector<32x32xf32>, vector<32x128xf32>, vector<32x128xf32> -> vector<32x128xf32>
    %c0_6 = arith.constant 0 : index
    %c0_7 = arith.constant 0 : index
    %5 = vector.load %arg3[%c0_6, %c0_7] : memref<1x128xf32, #tpu.memory_space<vmem>>, vector<1x128xf32>
    %6 = vector.broadcast %5 : vector<1x128xf32> to vector<32x128xf32>
    %7 = arith.addf %4, %6 : vector<32x128xf32>
    %cst_8 = arith.constant 0.000000e+00 : f32
    %8 = vector.broadcast %cst_8 : f32 to vector<32x128xf32>
    %9 = arith.maximumf %7, %8 : vector<32x128xf32>
    %c0_9 = arith.constant 0 : index
    %c0_10 = arith.constant 0 : index
    %10 = vector.load %arg4[%c0_9, %c0_10] : memref<128x128xf32, #tpu.memory_space<vmem>>, vector<128x128xf32>
    %cst_11 = arith.constant dense<0.000000e+00> : vector<32x128xf32>
    %11 = tpu.matmul %9, %10, %cst_11 {dimension_numbers = #tpu.dot_dimension_numbers<[1], [0], [0], [1], [0, 0, 1, 1], [], []>} : vector<32x128xf32>, vector<128x128xf32>, vector<32x128xf32> -> vector<32x128xf32>
    %c0_12 = arith.constant 0 : index
    %c0_13 = arith.constant 0 : index
    %12 = vector.load %arg1[%c0_12, %c0_13] : memref<32x32xf32, #tpu.memory_space<vmem>>, vector<32x32xf32>
    %cst_14 = arith.constant dense<0.000000e+00> : vector<32x128xf32>
    %13 = tpu.matmul %12, %11, %cst_14 {dimension_numbers = #tpu.dot_dimension_numbers<[1], [0], [0], [1], [0, 0, 1, 1], [], []>} : vector<32x32xf32>, vector<32x128xf32>, vector<32x128xf32> -> vector<32x128xf32>
    %c0_15 = arith.constant 0 : index
    %c0_16 = arith.constant 0 : index
    %14 = vector.load %arg5[%c0_15, %c0_16] : memref<1x128xf32, #tpu.memory_space<vmem>>, vector<1x128xf32>
    %15 = vector.broadcast %14 : vector<1x128xf32> to vector<32x128xf32>
    %16 = arith.addf %13, %15 : vector<32x128xf32>
    %c0_17 = arith.constant 0 : index
    %c0_18 = arith.constant 0 : index
    %17 = vector.load %arg6[%c0_17, %c0_18] : memref<32x128xf32, #tpu.memory_space<vmem>>, vector<32x128xf32>
    tpu.vector_store %arg6[%c0_17, %c0_18], %16 {strides = array<i32>} : memref<32x128xf32, #tpu.memory_space<vmem>>, vector<32x128xf32>,
    return
  }
}

</mosaic_0001>

<bundles_post_ra>
// kernel: tpu_custom_call.1
= control target key start
LH: loop header
LB: loop body
LE: loop exit
PB: predicated region body
PF: predicated region fallthrough
CT: control target
= control target key end

     0   :  { %11 = vsyncpa [#allocation3], 0  ;;  %s448_s0 = inlined_call_operand.vmem [shape: f32[32,16], index: 0, kind: input, shape index: {}]   ;;  %s449_s1 = inlined_call_operand.vmem [shape: f32[32,32], index: 1, kind: input, shape index: {}]   ;;  %s450_s2 = inlined_call_operand.vmem [shape: f32[16,128], index: 2, kind: input, shape index: {}]   ;;  %s451_s3 = inlined_call_operand.vmem [shape: f32[1,128], index: 3, kind: input, shape index: {}]   ;;  %s452_s4 = inlined_call_operand.hbm [shape: f32[128,128], index: 4, kind: input, shape index: {}]   ;;  %s453_s5 = inlined_call_operand.vmem [shape: f32[1,128], index: 5, kind: input, shape index: {}]   ;;  %s454_s6 = inlined_call_operand.hbm [shape: f32[32,128], index: 6, kind: output, shape index: {}]  }
   0x1   :  { %12 = vsyncpa [#allocation4], 0  ;;  %s25_s23 = sshll.u32 %s452_s4, 4  ;;  %s345_s24 = smov [#allocation2]   ;;  %s26_s23 = int_to_ptr.hbm [resolvable:$true] %s25_s23 }
   0x2   :  { %s27_s25 = sshll.u32 %s345_s24, 4  ;;  %s346_s26 = smov 128   ;;  %s28_s25 = int_to_ptr.vmem [resolvable:$true] %s27_s25 }
   0x3   :  { %s347_s27 = smov 8  }
   0x4   :  { %33 = dma.hbm_to_vmem [thread:$0]  %s26_s23, 2048, %s28_s25, [#allocation3], %s346_s26, %s346_s26, %s347_s27  }
   0x5   :  { %341 = dma.done.wait [#allocation3], 2048  }
   0x6   :  { %342 = vsyncadd [#allocation3], 4294965248  ;;  %v45_v0 = vld [vmem:[%s450_s2 + $0x8] sm:$0xff]  ;;  %v44_v1 = vld [vmem:[%s450_s2] sm:$0xff]  ;;  %vm46_vm0 = vcmask 130048   ;;  %vm96_vm1 = vcmask 261120  }
   0x7   :  { %73 = vmatpush.msra.mxu0 %v45_v0  ;;  %v40_v2 = vld [vmem:[%s448_s0] sm:$0xff]  ;;  %v41_v3 = vld [vmem:[%s448_s0 + $0x8] sm:$0xff]  ;;  %v42_v4 = vld [vmem:[%s448_s0 + $0x10] sm:$0xff]  ;;  %s348_s23 = smov [#allocation5]   ;;  %s230_s29 = sshll.u32 %s454_s6, 4  ;;  %s231_s29 = int_to_ptr.hbm [resolvable:$true] %s230_s29 }
   0x8   :  { %v43_v5 = vld [vmem:[%s448_s0 + $0x18] sm:$0xff]  ;;  %v156_v11 = vld [vmem:[#allocation2 + $0x70] sm:$0xff]  ;;  %v155_v12 = vld [vmem:[#allocation2 + $0x68] sm:$0xff]  ;;  %s228_s24 = sshll.u32 %s348_s23, 4  ;;  %s229_s24 = int_to_ptr.vmem [resolvable:$true] %s228_s24 }
   0x9   :  { %74 = vmatpush.msra.mxu0 %v44_v1  ;;  %v157_v10 = vld [vmem:[#allocation2 + $0x78] sm:$0xff]  ;;  %v154_v13 = vld [vmem:[#allocation2 + $0x60] sm:$0xff]  ;;  %v152_v16 = vld [vmem:[#allocation2 + $0x50] sm:$0xff] }
   0xa   :  { %243 = vmatmul.msk.f32.vlgmr.msra.gmra.mxu0 %vm46_vm0, %v40_v2  ;;  %256 = vmatpush.msra.mxu2 %v157_v10  ;;  %v411_v14 = vld [vmem:[%s449_s1] sm:$0xff]  ;;  %v153_v15 = vld [vmem:[#allocation2 + $0x58] sm:$0xff]  ;;  %v151_v17 = vld [vmem:[#allocation2 + $0x48] sm:$0xff] }
   0xb   :  { %158 = vmatpush.msrb.mxu0 %v157_v10  ;;  %v150_v18 = vld [vmem:[#allocation2 + $0x40] sm:$0xff]  ;;  %v418_v19 = vld [vmem:[%s449_s1 + $0x8] sm:$0xff]  ;;  %v149_v20 = vld [vmem:[#allocation2 + $0x38] sm:$0xff] }
   0xc   :  { %258 = vmatpush.msra.mxu2 %v156_v11  ;;  %v148_v21 = vld [vmem:[#allocation2 + $0x30] sm:$0xff]  ;;  %v147_v22 = vld [vmem:[#allocation2 + $0x28] sm:$0xff]  ;;  %v146_v23 = vld [vmem:[#allocation2 + $0x20] sm:$0xff] }
   0xd   :  { %159 = vmatpush.msrb.mxu0 %v156_v11  ;;  %v90_v24 = vld [vmem:[%s449_s1 + $0x10] sm:$0xff]  ;;  %v145_v25 = vld [vmem:[#allocation2 + $0x18] sm:$0xff]  ;;  %v143_v28 = vld [vmem:[#allocation2 + $0x8] sm:$0xff] }
   0xe   :  { %260 = vmatpush.msra.mxu2 %v155_v12  ;;  %v91_v26 = vld [vmem:[%s449_s1 + $0x18] sm:$0xff]  ;;  %v144_v27 = vld [vmem:[#allocation2 + $0x10] sm:$0xff]  ;;  %v142_v29 = vld [vmem:[#allocation2] sm:$0xff] }
   0xf   :  { %160 = vmatpush.msrb.mxu0 %v155_v12  ;;  %v291_v30 = vld [vmem:[%s451_s3] ss:$0 sm:$0xff] }
  0x10   :  { %262 = vmatpush.msra.mxu2 %v154_v13  ;;  %v292_v47 = vld [vmem:[%s453_s5] ss:$0 sm:$0xff] }
  0x11   :  { %161 = vmatpush.msrb.mxu0 %v154_v13 }
  0x12   :  { %244 = vmatmul.msk.f32.gmra.mxu0 %vm46_vm0, %v41_v3  ;;  %264 = vmatpush.msra.mxu2 %v153_v15 }
  0x13   :  { %162 = vmatpush.msrb.mxu0 %v153_v15 }
  0x14   :  { %266 = vmatpush.msra.mxu2 %v152_v16 }
  0x15   :  { %163 = vmatpush.msrb.mxu0 %v152_v16 }
  0x16   :  { %268 = vmatpush.msra.mxu2 %v151_v17 }
  0x17   :  { %164 = vmatpush.msrb.mxu0 %v151_v17 }
  0x18   :  { %270 = vmatpush.msra.mxu2 %v150_v18 }
  0x19   :  { %165 = vmatpush.msrb.mxu0 %v150_v18 }
  0x1a   :  { %245 = vmatmul.msk.f32.gmra.mxu0 %vm46_vm0, %v42_v4  ;;  %272 = vmatpush.msra.mxu2 %v149_v20 }
  0x1b   :  { %166 = vmatpush.msrb.mxu0 %v149_v20 }
  0x1c   :  { %274 = vmatpush.msra.mxu2 %v148_v21 }
  0x1d   :  { %167 = vmatpush.msrb.mxu0 %v148_v21 }
  0x1e   :  { %276 = vmatpush.msra.mxu2 %v147_v22 }
  0x1f   :  { %168 = vmatpush.msrb.mxu0 %v147_v22 }
  0x20   :  { %278 = vmatpush.msra.mxu2 %v146_v23 }
  0x21   :  { %169 = vmatpush.msrb.mxu0 %v146_v23 }
  0x22   :  { %246 = vmatmul.msk.f32.gmra.mxu0 %vm46_vm0, %v43_v5  ;;  %280 = vmatpush.msra.mxu2 %v145_v25 }
  0x23   :  { %170 = vmatpush.msrb.mxu0 %v145_v25 }
  0x24   :  { %282 = vmatpush.msra.mxu2 %v144_v27 }
  0x25   :  { %171 = vmatpush.msrb.mxu0 %v144_v27 }
  0x26   :  { %284 = vmatpush.msra.mxu2 %v143_v28 }
  0x27   :  { %172 = vmatpush.msrb.mxu0 %v143_v28 }
  0x28   :  { %286 = vmatpush.msra.mxu2 %v142_v29 }
  0x29   :  { %173 = vmatpush.msrb.mxu0 %v142_v29 }
  0x87   :  { %v76_v6 = vpop.f32.mrf.mxu0 }
  0x8f   :  { %v79_v7 = vpop.f32.mrf.mxu0 }
  0x97   :  { %v82_v8 = vpop.f32.mrf.mxu0 }
  0x9f   :  { %v85_v9 = vpop.f32.mrf.mxu0 }
  0xa0   :  { %121 = vmatpush.msra.mxu1 %v85_v9 }
  0xa2   :  { %122 = vmatpush.msra.mxu1 %v82_v8 }
  0xa4   :  { %123 = vmatpush.msra.mxu1 %v79_v7 }
  0xa6   :  { %124 = vmatpush.msra.mxu1 %v76_v6 }
  0xa7   :  { %247 = vmatmul.msk.f32.vlgmr.msra.gmra.mxu1 %vm96_vm1, %v411_v14 }
  0xa8   :  { %255 = vmatpush.msrb.mxu1 %v157_v10 }
  0xaa   :  { %257 = vmatpush.msrb.mxu1 %v156_v11 }
  0xac   :  { %259 = vmatpush.msrb.mxu1 %v155_v12 }
  0xae   :  { %261 = vmatpush.msrb.mxu1 %v154_v13 }
  0xaf   :  { %248 = vmatmul.msk.f32.gmra.mxu1 %vm96_vm1, %v418_v19 }
  0xb0   :  { %263 = vmatpush.msrb.mxu1 %v153_v15 }
  0xb2   :  { %265 = vmatpush.msrb.mxu1 %v152_v16 }
  0xb4   :  { %267 = vmatpush.msrb.mxu1 %v151_v17 }
  0xb6   :  { %269 = vmatpush.msrb.mxu1 %v150_v18 }
  0xb7   :  { %249 = vmatmul.msk.f32.gmra.mxu1 %vm96_vm1, %v90_v24 }
  0xb8   :  { %271 = vmatpush.msrb.mxu1 %v149_v20 }
  0xba   :  { %273 = vmatpush.msrb.mxu1 %v148_v21 }
  0xbc   :  { %275 = vmatpush.msrb.mxu1 %v147_v22 }
  0xbe   :  { %277 = vmatpush.msrb.mxu1 %v146_v23 }
  0xbf   :  { %250 = vmatmul.msk.f32.gmra.mxu1 %vm96_vm1, %v91_v26 }
  0xc0   :  { %279 = vmatpush.msrb.mxu1 %v145_v25 }
  0xc2   :  { %281 = vmatpush.msrb.mxu1 %v144_v27 }
  0xc4   :  { %283 = vmatpush.msrb.mxu1 %v143_v28 }
  0xc6   :  { %285 = vmatpush.msrb.mxu1 %v142_v29 }
 0x124   :  { %v126_v31 = vpop.f32.mrf.mxu1 }
 0x125   :  { %v127_v32 = vadd.f32 %v291_v30, %v126_v31 }
 0x127   :  { %v138_v33 = vmax.f32 %v127_v32, 0.0 }
 0x129   :  { %174 = vmatmul.f32.vlgmr.msrb.gmra.mxu0 %v138_v33 }
 0x12c   :  { %v129_v34 = vpop.f32.mrf.mxu1 }
 0x12d   :  { %v130_v35 = vadd.f32 %v291_v30, %v129_v34 }
 0x12f   :  { %v139_v36 = vmax.f32 %v130_v35, 0.0 }
 0x131   :  { %177 = vmatmul.f32.vlgmr.msrb.gmra.mxu1 %v139_v36 }
 0x134   :  { %v132_v37 = vpop.f32.mrf.mxu1 }
 0x135   :  { %v133_v38 = vadd.f32 %v291_v30, %v132_v37 }
 0x137   :  { %v140_v39 = vmax.f32 %v133_v38, 0.0 }
 0x139   :  { %180 = vmatmul.f32.vlgmr.msra.gmra.mxu2 %v140_v39 }
 0x13c   :  { %v135_v40 = vpop.f32.mrf.mxu1 }
 0x13d   :  { %v136_v41 = vadd.f32 %v291_v30, %v135_v40 }
 0x13f   :  { %v141_v42 = vmax.f32 %v136_v41, 0.0 }
 0x141   :  { %183 = vmatmul.f32.gmra.mxu2 %v141_v42 }
 0x1a6   :  { %v175_v46 = vpop.f32.mrf.mxu0 }
 0x1ae   :  { %v178_v45 = vpop.f32.mrf.mxu1 }
 0x1bc   :  { %v181_v43 = vpop.f32.mrf.mxu2 }
 0x1c4   :  { %v184_v44 = vpop.f32.mrf.mxu2 }
 0x1c5   :  { %203 = vmatpush.msra.mxu3 %v184_v44 }
 0x1c7   :  { %204 = vmatpush.msra.mxu3 %v181_v43 }
 0x1c9   :  { %205 = vmatpush.msra.mxu3 %v178_v45 }
 0x1cb   :  { %206 = vmatpush.msra.mxu3 %v175_v46 }
 0x1cc   :  { %251 = vmatmul.msk.f32.vlgmr.msra.gmra.mxu3 %vm96_vm1, %v411_v14 }
 0x1d4   :  { %252 = vmatmul.msk.f32.gmra.mxu3 %vm96_vm1, %v418_v19 }
 0x1dc   :  { %253 = vmatmul.msk.f32.gmra.mxu3 %vm96_vm1, %v90_v24 }
 0x1e4   :  { %254 = vmatmul.msk.f32.gmra.mxu3 %vm96_vm1, %v91_v26 }
 0x24f   :  { %v208_v48 = vpop.f32.mrf.mxu3 }
 0x250   :  { %v209_v49 = vadd.f32 %v292_v47, %v208_v48 }
 0x252   :  { %220 = vst [vmem:[#allocation5] sm:$0xff] %v209_v49 }
 0x257   :  { %v211_v50 = vpop.f32.mrf.mxu3 }
 0x258   :  { %v212_v51 = vadd.f32 %v292_v47, %v211_v50 }
 0x25a   :  { %221 = vst [vmem:[#allocation5 + $0x8] sm:$0xff] %v212_v51 }
 0x25f   :  { %v214_v52 = vpop.f32.mrf.mxu3 }
 0x260   :  { %v215_v53 = vadd.f32 %v292_v47, %v214_v52 }
 0x262   :  { %222 = vst [vmem:[#allocation5 + $0x10] sm:$0xff] %v215_v53 }
 0x267   :  { %v217_v54 = vpop.f32.mrf.mxu3 }
 0x268   :  { %v218_v55 = vadd.f32 %v292_v47, %v217_v54 }
 0x26a   :  { %223 = vst [vmem:[#allocation5 + $0x18] sm:$0xff] %v218_v55 }
 0x26b   :  { %236 = dma.vmem_to_hbm [thread:$0]  %s229_s24, 512, %s231_s29, [#allocation4], %s346_s26, %s346_s26, %s347_s27  }
 0x26c   :  { %343 = dma.done.wait [#allocation4], 512  }
 0x26d   :  { %344 = vsyncadd [#allocation4], 4294966784 }
 0x26e   :  { %241 = vsyncpa [#allocation3], 1 }
 0x26f   :  { %242 = vsyncpa [#allocation4], 1 }

</bundles_post_ra>
